<compile_context>
chip_gen: v7x
topology: tpu7x:2x2x1
jax: 0.10.0
libtpu: 0.0.40
codegen_flags: <defaults>
</compile_context>

<pallas_src>
import jax
import jax.numpy as jnp
from jax.experimental import pallas as pl
from jax.experimental.pallas import tpu as pltpu

EPS = 1e-5
ROW = 16  # bf16 sublane packing: 16 rows / vreg


def _round_up(a, b):
    return (a + b - 1) // b * b


def _layernorm(x, gamma, beta):
    # One-pass statistics: two independent lane reductions, var = E[x^2] - mu^2.
    inv_n = 1.0 / x.shape[-1]
    s1 = jnp.sum(x, axis=-1, keepdims=True)
    s2 = jnp.sum(x * x, axis=-1, keepdims=True)
    mu = s1 * inv_n
    var = s2 * inv_n - mu * mu
    return (x - mu) * jax.lax.rsqrt(var + EPS) * gamma + beta


def basicnet_kernel(x_ref,
                    w0_ref, v0_ref,
                    w1_ref, v1_ref,
                    wf_ref, bf_ref,
                    out_ref):
    # x_ref: (TM, D_in) bf16, already feature-normalized + concatenated.
    # v{0,1}_ref: (3, h) f32 stacks: row 0 = bias, row 1 = ln_gamma, row 2 = ln_beta.
    x = x_ref[...]

    # --- MLPBlock 0: Linear -> LayerNorm -> ReLU -> Dropout(identity) ---
    h = jnp.dot(x, w0_ref[...], preferred_element_type=jnp.float32) + v0_ref[0:1, :]
    h = _layernorm(h, v0_ref[1:2, :], v0_ref[2:3, :])
    h = jnp.maximum(h, 0.0)

    # --- MLPBlock 1 ---
    h = jnp.dot(h.astype(jnp.bfloat16), w1_ref[...],
                preferred_element_type=jnp.float32) + v1_ref[0:1, :]
    h = _layernorm(h, v1_ref[1:2, :], v1_ref[2:3, :])
    h = jnp.maximum(h, 0.0)

    # --- final Linear head (out_dim-wide store; tiny HBM write) ---
    out_ref[...] = (jnp.dot(h.astype(jnp.bfloat16), wf_ref[...],
                            preferred_element_type=jnp.float32)
                    + bf_ref[...])


def _choose_tiling(batch, tm):
    """Pick (TM, b_pad, n_steps) with bounded padding and >=2 steps when possible."""
    b_min = _round_up(max(batch, 1), ROW)
    n_steps = max(2, pl.cdiv(b_min, tm))          # >=2 steps for v7x megacore
    tm_eff = _round_up(pl.cdiv(b_min, n_steps), ROW)
    tm_eff = min(tm_eff, b_min)
    n_steps = pl.cdiv(b_min, tm_eff)
    return tm_eff, n_steps * tm_eff, n_steps


def basicnet_forward(categorical_x, continuous_x, params, *, tm=1024):
    """params: dict of PyTorch-shaped (pre-transposed [in, out]) weights."""
    # Feature LayerNorm + concat in the wrapper (tiny; lets kernel start at MXU).
    cont = _layernorm(continuous_x.astype(jnp.float32),
                      params["norm_g"], params["norm_b"])
    x = jnp.concatenate([categorical_x.astype(jnp.float32), cont], axis=-1)
    x = x.astype(jnp.bfloat16)  # matmul consumes bf16 anyway -> halve the stream

    batch, d_in = x.shape
    h0 = params["w0"].shape[1]
    h1 = params["w1"].shape[1]
    out_dim = params["wf"].shape[1]

    TM, b_pad, n_steps = _choose_tiling(batch, tm)
    if b_pad != batch:
        x = jnp.pad(x, ((0, b_pad - batch), (0, 0)))

    # bf16 weights for the MXU; bias / LN params stay f32 (stacked per layer).
    w0 = params["w0"].astype(jnp.bfloat16)
    w1 = params["w1"].astype(jnp.bfloat16)
    wf = params["wf"].astype(jnp.bfloat16)
    v0 = jnp.concatenate([params["b0"], params["ln0_g"], params["ln0_b"]], axis=0)
    v1 = jnp.concatenate([params["b1"], params["ln1_g"], params["ln1_b"]], axis=0)
    bf = params["bf"]

    def row_map(i):
        return (i, 0)

    def const_map(i):
        return (0, 0)

    in_specs = [
        pl.BlockSpec((TM, d_in), row_map),       # activations (tiled over batch)
        pl.BlockSpec((d_in, h0), const_map),     # w0   (grid-resident)
        pl.BlockSpec((3, h0), const_map),        # [b0; ln0_g; ln0_b]
        pl.BlockSpec((h0, h1), const_map),       # w1
        pl.BlockSpec((3, h1), const_map),        # [b1; ln1_g; ln1_b]
        pl.BlockSpec((h1, out_dim), const_map),  # wf
        pl.BlockSpec((1, out_dim), const_map),   # bf
    ]

    flops = 2 * b_pad * (d_in * h0 + h0 * h1 + h1 * out_dim)
    transcendentals = 2 * b_pad  # one rsqrt per LayerNorm row inside kernel
    bytes_accessed = (b_pad * d_in * 2                              # bf16 activations in
                      + (d_in * h0 + h0 * h1 + h1 * out_dim) * 2    # bf16 weights
                      + (3 * h0 + 3 * h1 + out_dim) * 4             # f32 vec params
                      + b_pad * out_dim * 4)                        # f32 output

    out = pl.pallas_call(
        basicnet_kernel,
        out_shape=jax.ShapeDtypeStruct((b_pad, out_dim), jnp.float32),
        grid_spec=pltpu.PrefetchScalarGridSpec(
            num_scalar_prefetch=0,
            grid=(n_steps,),
            in_specs=in_specs,
            out_specs=pl.BlockSpec((TM, out_dim), row_map),
        ),
        compiler_params=pltpu.CompilerParams(
            dimension_semantics=("parallel",),
        ),
        cost_estimate=pl.CostEstimate(
            flops=flops,
            transcendentals=transcendentals,
            bytes_accessed=bytes_accessed,
        ),
    )(x, w0, v0, w1, v1, wf, bf)

    return out[:batch]


def make_params(key, cat_count, num_continuous, hidden_dims, output_dim):
    """Deterministic synthetic parameters (PyTorch shapes, pre-transposed)."""
    input_dim = cat_count + num_continuous
    dims = [input_dim] + hidden_dims
    keys = jax.random.split(key, 8)

    def lin(k, d_in, d_out):
        bound = 1.0 / jnp.sqrt(d_in)
        kw, kb = jax.random.split(k)
        w = jax.random.uniform(kw, (d_in, d_out), jnp.float32, -bound, bound)
        b = jax.random.uniform(kb, (1, d_out), jnp.float32, -bound, bound)
        return w, b

    w0, b0 = lin(keys[0], dims[0], dims[1])
    w1, b1 = lin(keys[1], dims[1], dims[2])
    wf, bf = lin(keys[2], dims[2], output_dim)

    return {
        "norm_g": jnp.ones((1, num_continuous), jnp.float32),
        "norm_b": jnp.zeros((1, num_continuous), jnp.float32),
        "w0": w0, "b0": b0,
        "ln0_g": jnp.ones((1, dims[1]), jnp.float32),
        "ln0_b": jnp.zeros((1, dims[1]), jnp.float32),
        "w1": w1, "b1": b1,
        "ln1_g": jnp.ones((1, dims[2]), jnp.float32),
        "ln1_b": jnp.zeros((1, dims[2]), jnp.float32),
        "wf": wf, "bf": bf,
    }


def reference_forward(categorical_x, continuous_x, params, *, bf16_mm=False):
    """Pure-JAX reference mirroring the PyTorch module (eval mode).

    bf16_mm=True mirrors the kernel's bf16-matmul/f32-accumulate numerics.
    """
    def ln(x, g, b):
        mu = jnp.mean(x, -1, keepdims=True)
        var = jnp.mean((x - mu) ** 2, -1, keepdims=True)
        return (x - mu) / jnp.sqrt(var + EPS) * g + b

    def mm(a, w):
        if bf16_mm:
            return jnp.dot(a.astype(jnp.bfloat16), w.astype(jnp.bfloat16),
                           preferred_element_type=jnp.float32)
        return a @ w

    cont = ln(continuous_x, params["norm_g"], params["norm_b"])
    x = jnp.concatenate([categorical_x, cont], axis=-1)
    x = jnp.maximum(ln(mm(x, params["w0"]) + params["b0"],
                       params["ln0_g"], params["ln0_b"]), 0.0)
    x = jnp.maximum(ln(mm(x, params["w1"]) + params["b1"],
                       params["ln1_g"], params["ln1_b"]), 0.0)
    return mm(x, params["wf"]) + params["bf"]


if __name__ == "__main__":
    key = jax.random.PRNGKey(0)
    k_cat, k_cont, k_params = jax.random.split(key, 3)

    batch = 30               # deliberately unaligned: exercises batch padding
    cat_count = 4            # len(vocabulary)
    num_continuous = 4       # num_continuous_features
    mlp_hidden_dims = [32, 32]
    output_dim = 3

    # categorical_x is concatenated directly with floats in this module, so it
    # is modeled as a float tensor (pre-embedded / label-encoded values).
    categorical_x = jax.random.normal(k_cat, (batch, cat_count), jnp.float32)
    continuous_x = jax.random.normal(k_cont, (batch, num_continuous), jnp.float32)

    params = make_params(k_params, cat_count, num_continuous,
                         mlp_hidden_dims, output_dim)

    # Small row-tile cap so the test exercises a multi-step ("parallel") grid.
    out = basicnet_forward(categorical_x, continuous_x, params, tm=16)
    out = jax.block_until_ready(out)
    assert out.shape == (batch, output_dim)

    # Tight check vs a reference that mirrors the kernel's bf16 matmul numerics.
    ref_bf16 = reference_forward(categorical_x, continuous_x, params, bf16_mm=True)
    assert jnp.allclose(out, ref_bf16, atol=2e-3, rtol=2e-3)

    # Loose check vs the exact f32 module semantics (bf16-weight quantization).
    ref_f32 = reference_forward(categorical_x, continuous_x, params)
    assert jnp.allclose(out, ref_f32, atol=5e-2, rtol=5e-2)

    # Also exercise the default (large-TM) path once.
    out2 = jax.block_until_ready(basicnet_forward(categorical_x, continuous_x, params))
    assert jnp.allclose(out2, out, atol=1e-5, rtol=1e-5)

    print("KERNEL_OK")
</pallas_src>

<mosaic_0001>
module attributes {stable_mosaic.version = 11 : i64} {
  func.func @basicnet_kernel(%arg0: i32, %arg1: memref<16x8xbf16, #tpu.memory_space<vmem>>, %arg2: memref<8x32xbf16, #tpu.memory_space<vmem>>, %arg3: memref<3x32xf32, #tpu.memory_space<vmem>>, %arg4: memref<32x32xbf16, #tpu.memory_space<vmem>>, %arg5: memref<3x32xf32, #tpu.memory_space<vmem>>, %arg6: memref<32x3xbf16, #tpu.memory_space<vmem>>, %arg7: memref<1x3xf32, #tpu.memory_space<vmem>>, %arg8: memref<16x3xf32, #tpu.memory_space<vmem>>) attributes {dimension_semantics = [#tpu.dimension_semantics<parallel>], iteration_bounds = array<i64: 2>, scalar_prefetch = 0 : i64, scratch_operands = 0 : i64, tpu.core_type = #tpu.core_type<tc>, window_params = [{transform_indices = @transform_0, window_bounds = array<i64: 16, 8>}, {pipeline_mode = #tpu.pipeline_mode<synchronous>, transform_indices = @transform_1, window_bounds = array<i64: 8, 32>}, {pipeline_mode = #tpu.pipeline_mode<synchronous>, transform_indices = @transform_2, window_bounds = array<i64: 3, 32>}, {pipeline_mode = #tpu.pipeline_mode<synchronous>, transform_indices = @transform_3, window_bounds = array<i64: 32, 32>}, {pipeline_mode = #tpu.pipeline_mode<synchronous>, transform_indices = @transform_4, window_bounds = array<i64: 3, 32>}, {pipeline_mode = #tpu.pipeline_mode<synchronous>, transform_indices = @transform_5, window_bounds = array<i64: 32, 3>}, {pipeline_mode = #tpu.pipeline_mode<synchronous>, transform_indices = @transform_6, window_bounds = array<i64: 1, 3>}, {transform_indices = @transform_7, window_bounds = array<i64: 16, 3>}]} {
    %c0 = arith.constant 0 : index
    %c0_0 = arith.constant 0 : index
    %0 = vector.load %arg1[%c0, %c0_0] : memref<16x8xbf16, #tpu.memory_space<vmem>>, vector<16x8xbf16>
    %c0_1 = arith.constant 0 : index
    %c0_2 = arith.constant 0 : index
    %1 = vector.load %arg2[%c0_1, %c0_2] : memref<8x32xbf16, #tpu.memory_space<vmem>>, vector<8x32xbf16>
    %cst = arith.constant dense<0.000000e+00> : vector<16x32xf32>
    %2 = tpu.matmul %0, %1, %cst {dimension_numbers = #tpu.dot_dimension_numbers<[1], [0], [0], [1], [0, 0, 1, 1], [], []>} : vector<16x8xbf16>, vector<8x32xbf16>, vector<16x32xf32> -> vector<16x32xf32>
    %c0_3 = arith.constant 0 : index
    %c0_4 = arith.constant 0 : index
    %3 = vector.load %arg3[%c0_3, %c0_4] : memref<3x32xf32, #tpu.memory_space<vmem>>, vector<1x32xf32>
    %4 = vector.broadcast %3 : vector<1x32xf32> to vector<16x32xf32>
    %5 = arith.addf %2, %4 : vector<16x32xf32>
    %c1 = arith.constant 1 : index
    %c0_5 = arith.constant 0 : index
    %6 = vector.load %arg3[%c1, %c0_5] : memref<3x32xf32, #tpu.memory_space<vmem>>, vector<1x32xf32>
    %c2 = arith.constant 2 : index
    %c0_6 = arith.constant 0 : index
    %7 = vector.load %arg3[%c2, %c0_6] : memref<3x32xf32, #tpu.memory_space<vmem>>, vector<1x32xf32>
    %cst_7 = arith.constant dense<0.000000e+00> : vector<16xf32>
    %8 = vector.multi_reduction <add>, %5, %cst_7 [1] : vector<16x32xf32> to vector<16xf32>
    %9 = vector.shape_cast %8 : vector<16xf32> to vector<16x1xf32>
    %10 = arith.mulf %5, %5 : vector<16x32xf32>
    %cst_8 = arith.constant dense<0.000000e+00> : vector<16xf32>
    %11 = vector.multi_reduction <add>, %10, %cst_8 [1] : vector<16x32xf32> to vector<16xf32>
    %12 = vector.shape_cast %11 : vector<16xf32> to vector<16x1xf32>
    %cst_9 = arith.constant 3.125000e-02 : f32
    %13 = vector.broadcast %cst_9 : f32 to vector<16x1xf32>
    %14 = arith.mulf %9, %13 : vector<16x1xf32>
    %cst_10 = arith.constant 3.125000e-02 : f32
    %15 = vector.broadcast %cst_10 : f32 to vector<16x1xf32>
    %16 = arith.mulf %12, %15 : vector<16x1xf32>
    %17 = arith.mulf %14, %14 : vector<16x1xf32>
    %18 = arith.subf %16, %17 : vector<16x1xf32>
    %19 = vector.broadcast %14 : vector<16x1xf32> to vector<16x32xf32>
    %20 = arith.subf %5, %19 : vector<16x32xf32>
    %cst_11 = arith.constant 9.99999974E-6 : f32
    %21 = vector.broadcast %cst_11 : f32 to vector<16x1xf32>
    %22 = arith.addf %18, %21 : vector<16x1xf32>
    %23 = math.rsqrt %22 : vector<16x1xf32>
    %24 = vector.broadcast %23 : vector<16x1xf32> to vector<16x32xf32>
    %25 = arith.mulf %20, %24 : vector<16x32xf32>
    %26 = vector.broadcast %6 : vector<1x32xf32> to vector<16x32xf32>
    %27 = arith.mulf %25, %26 : vector<16x32xf32>
    %28 = vector.broadcast %7 : vector<1x32xf32> to vector<16x32xf32>
    %29 = arith.addf %27, %28 : vector<16x32xf32>
    %cst_12 = arith.constant 0.000000e+00 : f32
    %30 = vector.broadcast %cst_12 : f32 to vector<16x32xf32>
    %31 = arith.maximumf %29, %30 : vector<16x32xf32>
    %32 = arith.truncf %31 : vector<16x32xf32> to vector<16x32xbf16>
    %c0_13 = arith.constant 0 : index
    %c0_14 = arith.constant 0 : index
    %33 = vector.load %arg4[%c0_13, %c0_14] : memref<32x32xbf16, #tpu.memory_space<vmem>>, vector<32x32xbf16>
    %cst_15 = arith.constant dense<0.000000e+00> : vector<16x32xf32>
    %34 = tpu.matmul %32, %33, %cst_15 {dimension_numbers = #tpu.dot_dimension_numbers<[1], [0], [0], [1], [0, 0, 1, 1], [], []>} : vector<16x32xbf16>, vector<32x32xbf16>, vector<16x32xf32> -> vector<16x32xf32>
    %c0_16 = arith.constant 0 : index
    %c0_17 = arith.constant 0 : index
    %35 = vector.load %arg5[%c0_16, %c0_17] : memref<3x32xf32, #tpu.memory_space<vmem>>, vector<1x32xf32>
    %36 = vector.broadcast %35 : vector<1x32xf32> to vector<16x32xf32>
    %37 = arith.addf %34, %36 : vector<16x32xf32>
    %c1_18 = arith.constant 1 : index
    %c0_19 = arith.constant 0 : index
    %38 = vector.load %arg5[%c1_18, %c0_19] : memref<3x32xf32, #tpu.memory_space<vmem>>, vector<1x32xf32>
    %c2_20 = arith.constant 2 : index
    %c0_21 = arith.constant 0 : index
    %39 = vector.load %arg5[%c2_20, %c0_21] : memref<3x32xf32, #tpu.memory_space<vmem>>, vector<1x32xf32>
    %cst_22 = arith.constant dense<0.000000e+00> : vector<16xf32>
    %40 = vector.multi_reduction <add>, %37, %cst_22 [1] : vector<16x32xf32> to vector<16xf32>
    %41 = vector.shape_cast %40 : vector<16xf32> to vector<16x1xf32>
    %42 = arith.mulf %37, %37 : vector<16x32xf32>
    %cst_23 = arith.constant dense<0.000000e+00> : vector<16xf32>
    %43 = vector.multi_reduction <add>, %42, %cst_23 [1] : vector<16x32xf32> to vector<16xf32>
    %44 = vector.shape_cast %43 : vector<16xf32> to vector<16x1xf32>
    %cst_24 = arith.constant 3.125000e-02 : f32
    %45 = vector.broadcast %cst_24 : f32 to vector<16x1xf32>
    %46 = arith.mulf %41, %45 : vector<16x1xf32>
    %cst_25 = arith.constant 3.125000e-02 : f32
    %47 = vector.broadcast %cst_25 : f32 to vector<16x1xf32>
    %48 = arith.mulf %44, %47 : vector<16x1xf32>
    %49 = arith.mulf %46, %46 : vector<16x1xf32>
    %50 = arith.subf %48, %49 : vector<16x1xf32>
    %51 = vector.broadcast %46 : vector<16x1xf32> to vector<16x32xf32>
    %52 = arith.subf %37, %51 : vector<16x32xf32>
    %cst_26 = arith.constant 9.99999974E-6 : f32
    %53 = vector.broadcast %cst_26 : f32 to vector<16x1xf32>
    %54 = arith.addf %50, %53 : vector<16x1xf32>
    %55 = math.rsqrt %54 : vector<16x1xf32>
    %56 = vector.broadcast %55 : vector<16x1xf32> to vector<16x32xf32>
    %57 = arith.mulf %52, %56 : vector<16x32xf32>
    %58 = vector.broadcast %38 : vector<1x32xf32> to vector<16x32xf32>
    %59 = arith.mulf %57, %58 : vector<16x32xf32>
    %60 = vector.broadcast %39 : vector<1x32xf32> to vector<16x32xf32>
    %61 = arith.addf %59, %60 : vector<16x32xf32>
    %cst_27 = arith.constant 0.000000e+00 : f32
    %62 = vector.broadcast %cst_27 : f32 to vector<16x32xf32>
    %63 = arith.maximumf %61, %62 : vector<16x32xf32>
    %64 = arith.truncf %63 : vector<16x32xf32> to vector<16x32xbf16>
    %c0_28 = arith.constant 0 : index
    %c0_29 = arith.constant 0 : index
    %65 = vector.load %arg6[%c0_28, %c0_29] : memref<32x3xbf16, #tpu.memory_space<vmem>>, vector<32x3xbf16>
    %cst_30 = arith.constant dense<0.000000e+00> : vector<16x3xf32>
    %66 = tpu.matmul %64, %65, %cst_30 {dimension_numbers = #tpu.dot_dimension_numbers<[1], [0], [0], [1], [0, 0, 1, 1], [], []>} : vector<16x32xbf16>, vector<32x3xbf16>, vector<16x3xf32> -> vector<16x3xf32>
    %c0_31 = arith.constant 0 : index
    %c0_32 = arith.constant 0 : index
    %67 = vector.load %arg7[%c0_31, %c0_32] : memref<1x3xf32, #tpu.memory_space<vmem>>, vector<1x3xf32>
    %68 = vector.broadcast %67 : vector<1x3xf32> to vector<16x3xf32>
    %69 = arith.addf %66, %68 : vector<16x3xf32>
    %c0_33 = arith.constant 0 : index
    %c0_34 = arith.constant 0 : index
    %70 = vector.load %arg8[%c0_33, %c0_34] : memref<16x3xf32, #tpu.memory_space<vmem>>, vector<16x3xf32>
    tpu.vector_store %arg8[%c0_33, %c0_34], %69 {strides = array<i32>} : memref<16x3xf32, #tpu.memory_space<vmem>>, vector<16x3xf32>,
    return
  }
  func.func @transform_0(%arg0: i32) -> (i32, i32) {
    %c0_i32 = arith.constant 0 : i32
    %c0_i32_0 = arith.constant 0 : i32
    return %arg0, %c0_i32 : i32, i32
  }
  func.func @transform_1(%arg0: i32) -> (i32, i32) {
    %c0_i32 = arith.constant 0 : i32
    %c0_i32_0 = arith.constant 0 : i32
    %c0_i32_1 = arith.constant 0 : i32
    return %c0_i32, %c0_i32_0 : i32, i32
  }
  func.func @transform_2(%arg0: i32) -> (i32, i32) {
    %c0_i32 = arith.constant 0 : i32
    %c0_i32_0 = arith.constant 0 : i32
    %c0_i32_1 = arith.constant 0 : i32
    return %c0_i32, %c0_i32_0 : i32, i32
  }
  func.func @transform_3(%arg0: i32) -> (i32, i32) {
    %c0_i32 = arith.constant 0 : i32
    %c0_i32_0 = arith.constant 0 : i32
    %c0_i32_1 = arith.constant 0 : i32
    return %c0_i32, %c0_i32_0 : i32, i32
  }
  func.func @transform_4(%arg0: i32) -> (i32, i32) {
    %c0_i32 = arith.constant 0 : i32
    %c0_i32_0 = arith.constant 0 : i32
    %c0_i32_1 = arith.constant 0 : i32
    return %c0_i32, %c0_i32_0 : i32, i32
  }
  func.func @transform_5(%arg0: i32) -> (i32, i32) {
    %c0_i32 = arith.constant 0 : i32
    %c0_i32_0 = arith.constant 0 : i32
    %c0_i32_1 = arith.constant 0 : i32
    return %c0_i32, %c0_i32_0 : i32, i32
  }
  func.func @transform_6(%arg0: i32) -> (i32, i32) {
    %c0_i32 = arith.constant 0 : i32
    %c0_i32_0 = arith.constant 0 : i32
    %c0_i32_1 = arith.constant 0 : i32
    return %c0_i32, %c0_i32_0 : i32, i32
  }
  func.func @transform_7(%arg0: i32) -> (i32, i32) {
    %c0_i32 = arith.constant 0 : i32
    %c0_i32_0 = arith.constant 0 : i32
    return %arg0, %c0_i32 : i32, i32
  }
}

</mosaic_0001>

<bundles_post_ra>
// kernel: tpu_custom_call.1
= control target key start
LH: loop header
LB: loop body
LE: loop exit
PB: predicated region body
PF: predicated region fallthrough
CT: control target
= control target key end

     0   :  { %s760_s24 = smov 0   ;;  %s835_s0 = inlined_call_operand.vmem [shape: bf16[32,8], index: 0, kind: input, shape index: {}]   ;;  %s836_s1 = inlined_call_operand.vmem [shape: bf16[8,32], index: 1, kind: input, shape index: {}]   ;;  %s837_s2 = inlined_call_operand.vmem [shape: f32[3,32], index: 2, kind: input, shape index: {}]   ;;  %s838_s3 = inlined_call_operand.vmem [shape: bf16[32,32], index: 3, kind: input, shape index: {}]   ;;  %s839_s4 = inlined_call_operand.vmem [shape: f32[3,32], index: 4, kind: input, shape index: {}]   ;;  %s840_s5 = inlined_call_operand.vmem [shape: bf16[32,3], index: 5, kind: input, shape index: {}]   ;;  %s841_s6 = inlined_call_operand.vmem [shape: f32[1,3], index: 6, kind: input, shape index: {}]   ;;  %s842_s7 = inlined_call_operand.vmem [shape: f32[32,3], index: 7, kind: output, shape index: {}]  }
   0x1 LB: > { %s631_s25 = sadd.s32 4294967295, %s716_s24   ;;  %p635_p0 = scmp.ge.s32.totalorder %s716_s24, 1  ;;  %s716_s24 = sphi %s760_s24, %s17_s24  }
   0x2   : > { %p238_p1 = scmp.lt.s32.totalorder %s716_s24, 3 }
   0x4   : > { %p239_p2 = pnand %p635_p0, %p238_p1 }
   0x5   : > { %v285_v0 = vld [vmem:[%s836_s1] sm:$0xf] (!%p239_p2)  ;;  %vm300_vm0 = vcmask (!%p239_p2), 1043456   ;;  %s636_s28 = sshll.u32 (!%p239_p2), %s631_s25, 1  ;;  %v718_v1 = vmov (!%p239_p2), 0.0   ;;  %vm719_vm1 = vmmov (!%p239_p2), 0  }
   0x6   : > { %242 = sbr.rel (%p239_p2) target bundleno = 1014 (0x3f6), region = 48  ;;  %665 = vmatprep.subr.bf16.mxu0 (!%p239_p2), %v718_v1  ;;  %v302_v2 = vsel (!%p239_p2), %vm300_vm0, %v285_v0, 0  ;;  %667 = vmatprep.mubr.msk.bf16.mxu0 (!%p239_p2), %vm719_vm1, %v718_v1  ;;  %p271_p3 = scmp.lt.s32.totalorder (!%p239_p2), %s636_s28, 3  ;;  %vm296_vm2 = vcmask (!%p239_p2), 64512   ;;  %v640_v4 = vld [vmem:[%s837_s2] ss:$0 sm:$0xff] (!%p239_p2) }
   0x7   : > { %666 = vmatpush3.bf16.msra.mxu0 (!%p239_p2), %v302_v2  ;;  %671 = vmatprep.subr.bf16.mxu1 (!%p239_p2), %v718_v1  ;;  %vm347_vm3 = vcmask (!%p239_p2), 261120   ;;  %v698_v17 = vld [vmem:[%s838_s3] sm:$0xff] (!%p239_p2)   ;;  %v699_v18 = vld [vmem:[%s838_s3 + $0x8] sm:$0xff] (!%p239_p2)   ;;  %vm572_vm4 = vcmask (!%p239_p2), 23552  }
   0x8   : > { %675 = vmatprep.mubr.msk.bf16.mxu1 (!%p239_p2), %vm719_vm1, %v718_v1  ;;  %679 = vmatprep.subr.bf16.mxu0 (!%p239_p2), %v718_v1  ;;  %v643_v35 = vld [vmem:[%s837_s2 + $0x1] ss:$0 sm:$0xff] (!%p239_p2)  ;;  %v644_v40 = vld [vmem:[%s837_s2 + $0x2] ss:$0 sm:$0xff] (!%p239_p2)  ;;  %v645_v48 = vld [vmem:[%s839_s4] ss:$0 sm:$0xff] (!%p239_p2) }
   0x9   : > { %672 = vmatpush3.bf16.msra.mxu1 (!%p239_p2), %v698_v17  ;;  %v700_v61 = vld [vmem:[%s840_s5] sm:$0xff] (!%p239_p2)   ;;  %v701_v62 = vld [vmem:[%s840_s5 + $0x8] sm:$0xff] (!%p239_p2)  }
   0xa   : > { %673 = vmatprep.subr.bf16.mxu1 (!%p239_p2), %v718_v1 }
   0xd   : > { %s844_s28 = smov (!%p271_p3, %s636_s28), 3  ;;  %674 = vmatpush3.bf16.msra.mxu1 %v699_v18 }
   0xe   : > { %s637_s29 = sshll.u32 %s844_s28, 2 }
   0xf   : > { %s274_s9 = scalar_lea.vmem %s835_s0, %s637_s29 }
  0x10   : > { %v697_v3 = vld [vmem:[%s274_s9] sm:$0xff]   ;;  %s639_s9 = sshll.u32 %s844_s28, 3 }
  0x11   : > { %668 = vmatmul.mubr.msk.bf16.vlgmr.msra.gmra.mrb[0].mxu0 %vm296_vm2, %v697_v3  ;;  %s280_s14 = scalar_lea.vmem %s842_s7, %s639_s9 }
  0x12   : > { %683 = vmatprep.mubr.msk.bf16.mxu0 %vm719_vm1, %v718_v1  ;;  %680 = vmatpush3.bf16.msra.mxu0 %v700_v61 }
  0x13   : > { %681 = vmatprep.subr.bf16.mxu0 %v718_v1 }
  0x16   : > { %682 = vmatpush3.bf16.msra.mxu0 %v701_v62 }
  0xe4   : > { %v338_v5 = vpop.f32.mrb[0].mxu0 }
  0xe5   : > { %v339_v6 = vadd.f32 %v640_v4, %v338_v5  ;;  %v669_v7 = vpop.f32.mrb[1].mxu0 }
  0xe6   : > { %v341_v8 = vpop.f32.mrb[2].mxu0 }
  0xe7   : > { %v342_v9 = vadd.f32 %v640_v4, %v341_v8  ;;  %v670_v10 = vpop.f32.mrb[3].mxu0  ;;  %v348_v11 = vsel %vm347_vm3, %v339_v6, 0.0  ;;  %v354_v12 = vmul.f32 %v339_v6, %v339_v6 }
  0xe8   : > { %349 = vadd.xlane.f32.xlu0 %v348_v11 }
  0xe9   : > { %v356_v13 = vsel %vm347_vm3, %v354_v12, 0.0  ;;  %v355_v14 = vmul.f32 %v342_v9, %v342_v9  ;;  %v351_v15 = vsel %vm347_vm3, %v342_v9, 0.0 }
  0xea   : > { %357 = vadd.xlane.f32.xlu1 %v356_v13 }
  0xeb   : > { %v359_v16 = vsel %vm347_vm3, %v355_v14, 0.0 }
  0xec   : > { %352 = vadd.xlane.f32.xlu0 %v351_v15  ;;  %v649_v15 = vld [vmem:[%s839_s4 + $0x1] ss:$0 sm:$0xff] }
  0xee   : > { %360 = vadd.xlane.f32.xlu1 %v359_v16 }
 0x175   : > { %v350_v19 = vpop.xlane.xlu0 %349 }
 0x176   : > { %v362_v20 = vmul.f32 0.03125, %v350_v19  ;;  %v650_v19 = vld [vmem:[%s839_s4 + $0x2] ss:$0 sm:$0xff] }
 0x177   : > { %v358_v21 = vpop.xlane.xlu1 %357 }
 0x178   : > { %v366_v22 = vmul.f32 %v362_v20, %v362_v20  ;;  %v364_v23 = vmul.f32 0.03125, %v358_v21  ;;  %v370_v33 = vsub.f32 %v339_v6, %v362_v20 }
 0x179   : > { %v353_v24 = vpop.xlane.xlu0 %352 }
 0x17a   : > { %v368_v25 = vsub.f32 %v364_v23, %v366_v22  ;;  %v363_v26 = vmul.f32 0.03125, %v353_v24 }
 0x17b   : > { %v361_v27 = vpop.xlane.xlu1 %360 }
 0x17c   : > { %v372_v28 = vadd.f32 1e-05, %v368_v25  ;;  %v367_v29 = vmul.f32 %v363_v26, %v363_v26  ;;  %v365_v30 = vmul.f32 0.03125, %v361_v27  ;;  %v371_v37 = vsub.f32 %v342_v9, %v363_v26 }
 0x17e   : > { %702 = vrsqrt.f32 %v372_v28  ;;  %v369_v31 = vsub.f32 %v365_v30, %v367_v29  ;;  %v651_v28 = vld [vmem:[%s841_s6] ss:$0 sm:$0xff] }
 0x180   : > { %v373_v32 = vadd.f32 1e-05, %v369_v31 }
 0x182   : > { %704 = vrsqrt.f32 %v373_v32 }
 0x188   : > { %v703_v34 = vpop.eup %702 }
 0x189   : > { %v376_v36 = vmul.f32 %v703_v34, %v370_v33 }
 0x18b   : > { %v382_v38 = vmul.f32 %v643_v35, %v376_v36 }
 0x18c   : > { %v705_v39 = vpop.eup %704 }
 0x18d   : > { %v377_v41 = vmul.f32 %v705_v39, %v371_v37  ;;  %v388_v43 = vadd.f32 %v644_v40, %v382_v38 }
 0x18f   : > { %v383_v42 = vmul.f32 %v643_v35, %v377_v41  ;;  %v390_v45 = vmax.f32 %v388_v43, 0.0 }
 0x191   : > { %v389_v44 = vadd.f32 %v644_v40, %v383_v42 }
 0x193   : > { %v391_v46 = vmax.f32 %v389_v44, 0.0 }
 0x195   : > { %v392_v47 = vpack.c.bf16 %v391_v46, %v390_v45 }
 0x197   : > { %676 = vmatmul.mubr.msk.bf16.vlgmr.msra.gmra.mrb[0].mxu1 %vm347_vm3, %v392_v47 }
 0x26a   : > { %v451_v49 = vpop.f32.mrb[0].mxu1 }
 0x26b   : > { %v452_v50 = vadd.f32 %v645_v48, %v451_v49  ;;  %v677_v51 = vpop.f32.mrb[1].mxu1 }
 0x26c   : > { %v454_v52 = vpop.f32.mrb[2].mxu1 }
 0x26d   : > { %v455_v53 = vadd.f32 %v645_v48, %v454_v52  ;;  %v678_v54 = vpop.f32.mrb[3].mxu1  ;;  %v460_v55 = vsel %vm347_vm3, %v452_v50, 0.0  ;;  %v466_v56 = vmul.f32 %v452_v50, %v452_v50 }
 0x26e   : > { %461 = vadd.xlane.f32.xlu0 %v460_v55 }
 0x26f   : > { %v463_v57 = vsel %vm347_vm3, %v455_v53, 0.0  ;;  %v467_v58 = vmul.f32 %v455_v53, %v455_v53  ;;  %v468_v59 = vsel %vm347_vm3, %v466_v56, 0.0 }
 0x270   : > { %464 = vadd.xlane.f32.xlu1 %v463_v57 }
 0x271   : > { %v471_v60 = vsel %vm347_vm3, %v467_v58, 0.0 }
 0x272   : > { %469 = vadd.xlane.f32.xlu0 %v468_v59 }
 0x274   : > { %472 = vadd.xlane.f32.xlu1 %v471_v60 }
 0x2fb   : > { %v462_v63 = vpop.xlane.xlu0 %461 }
 0x2fc   : > { %v474_v0 = vmul.f32 0.03125, %v462_v63 }
 0x2fd   : > { %v465_v2 = vpop.xlane.xlu1 %464 }
 0x2fe   : > { %v475_v3 = vmul.f32 0.03125, %v465_v2  ;;  %v478_v5 = vmul.f32 %v474_v0, %v474_v0  ;;  %v482_v14 = vsub.f32 %v452_v50, %v474_v0 }
 0x2ff   : > { %v470_v4 = vpop.xlane.xlu0 %469 }
 0x300   : > { %v476_v6 = vmul.f32 0.03125, %v470_v4  ;;  %v479_v8 = vmul.f32 %v475_v3, %v475_v3  ;;  %v483_v16 = vsub.f32 %v455_v53, %v475_v3 }
 0x301   : > { %v473_v7 = vpop.xlane.xlu1 %472 }
 0x302   : > { %v480_v9 = vsub.f32 %v476_v6, %v478_v5  ;;  %v477_v10 = vmul.f32 0.03125, %v473_v7 }
 0x304   : > { %v484_v11 = vadd.f32 1e-05, %v480_v9  ;;  %v481_v12 = vsub.f32 %v477_v10, %v479_v8 }
 0x306   : > { %706 = vrsqrt.f32 %v484_v11  ;;  %v485_v13 = vadd.f32 1e-05, %v481_v12 }
 0x308   : > { %708 = vrsqrt.f32 %v485_v13 }
 0x310   : > { %v707_v1 = vpop.eup %706 }
 0x311   : > { %v488_v17 = vmul.f32 %v707_v1, %v482_v14 }
 0x312   : > { %v709_v18 = vpop.eup %708 }
 0x313   : > { %v494_v20 = vmul.f32 %v649_v15, %v488_v17  ;;  %v489_v21 = vmul.f32 %v709_v18, %v483_v16 }
 0x315   : > { %v495_v22 = vmul.f32 %v649_v15, %v489_v21  ;;  %v500_v23 = vadd.f32 %v650_v19, %v494_v20 }
 0x317   : > { %v501_v24 = vadd.f32 %v650_v19, %v495_v22  ;;  %v502_v25 = vmax.f32 %v500_v23, 0.0 }
 0x319   : > { %v503_v26 = vmax.f32 %v501_v24, 0.0 }
 0x31b   : > { %v504_v27 = vpack.c.bf16 %v503_v26, %v502_v25 }
 0x31d   : > { %684 = vmatmul.mubr.msk.bf16.vlgmr.msra.gmra.mrb[4].mxu0 %vm347_vm3, %v504_v27 }
 0x3f0   : > { %v565_v29 = vpop.f32.mrb[4].mxu0 }
 0x3f1   : > { %v566_v30 = vadd.f32 %v651_v28, %v565_v29  ;;  %v685_v31 = vpop.f32.mrb[5].mxu0 }
 0x3f2   : > { %v568_v32 = vpop.f32.mrb[6].mxu0 }
 0x3f3   : > { %573 = vst.msk [vmem:[%s280_s14] sm:$0xff] %vm572_vm4, %v566_v30  ;;  %v569_v33 = vadd.f32 %v651_v28, %v568_v32  ;;  %v686_v34 = vpop.f32.mrb[7].mxu0 }
 0x3f5   : > { %574 = vst.msk [vmem:[%s280_s14 + $0x8] sm:$0xff] %vm572_vm4, %v569_v33 }
 0x3f6 PF: > { %s17_s24 = sadd.s32 1, %s716_s24  }
 0x3f7   : > { %p14_p4 = scmp.ge.s32.totalorder %s17_s24, 4  }
 0x3f9   :  { %16 = sbr.rel (!%p14_p4) target bundleno = 1 (0x1), region = 78 }

</bundles_post_ra>
